<compile_context>
chip_gen: v7x
topology: tpu7x:2x2x1
jax: 0.10.0
libtpu: 0.0.40
codegen_flags: <defaults>
</compile_context>

<pallas_src>
import functools

import jax
import jax.numpy as jnp
from jax.experimental import pallas as pl
from jax.experimental.pallas import tpu as pltpu

_LANE = 128
_MAX_TM = 16384                      # upper bound on the row tile
_X_TILE_BUDGET = 4 * 1024 * 1024     # ~4 MiB of f32 per x pipeline buffer


def _round_up(a, b):
    return ((a + b - 1) // b) * b


def _binary_output_kernel(x_ref, w_ref, b_ref, y_ref, scores_ref, lpart_ref,
                          *, tm, n_valid, needs_mask):
    i = pl.program_id(0)

    x = x_ref[...].astype(jnp.float32)                  # (tm, D), cast in-kernel
    w = w_ref[...].astype(jnp.float32)                  # (1, D), resident
    b = b_ref[0, 0]                                     # scalar bias from SMEM

    # Linear(dim, 1): VPU multiply + lane reduction (keep off the MXU).
    z = jnp.sum(x * w, axis=-1, keepdims=True) + b      # (tm, 1)
    s = jax.nn.sigmoid(z)                               # (tm, 1)
    scores_ref[...] = s.astype(scores_ref.dtype)

    # BCELoss with PyTorch's clamp of the log terms at -100.
    y = y_ref[...].astype(jnp.float32)                  # (tm, 1)
    log_s = jnp.maximum(jnp.log(s), -100.0)
    log_1ms = jnp.maximum(jnp.log(1.0 - s), -100.0)
    bce = -(y * log_s + (1.0 - y) * log_1ms)            # (tm, 1)

    if needs_mask:
        # Mask padded rows out of the loss sum (padding only exists when the
        # row count was rounded up to a tile multiple).
        row = i * tm + jax.lax.broadcasted_iota(jnp.int32, (tm, 1), 0)
        bce = jnp.where(row < n_valid, bce, 0.0)

    # Per-tile partial sum; the mean is finalized outside the kernel so every
    # grid step is independent and the axis can be marked "parallel".
    lpart_ref[...] = jnp.sum(bce, keepdims=True).reshape(1, 1, 1)


def binary_output_layer(x, y, weight, bias, *, tm=None):
    """x: (N, D); y: (N,) or (N, 1) in {0,1}; weight: (1, D); bias: (1,).

    Returns (scores (N, 1) float32, loss scalar float32), matching
    BinaryOutputLayer.forward (Linear -> Sigmoid -> BCELoss, mean reduction).
    """
    N, D = x.shape

    if tm is None:
        # Largest row tile whose f32 footprint is ~4 MiB per pipeline buffer.
        tm = _MAX_TM
        while tm > _LANE and tm * D * 4 > _X_TILE_BUDGET:
            tm //= 2
    assert tm % 8 == 0, "row tile must be a multiple of 8"
    tm = min(tm, _round_up(N, 16))          # don't over-pad tiny inputs
    n_pad = _round_up(N, tm)
    num_tiles = n_pad // tm
    needs_mask = n_pad != N

    # Native-dtype x (cast happens in-kernel). Pad ragged N wrapper-side.
    if needs_mask:
        x = jnp.pad(x, ((0, n_pad - N), (0, 0)))

    y_f = jnp.asarray(y).reshape(-1).astype(jnp.float32)   # y.view_as(scores).float()
    if needs_mask:
        y_f = jnp.pad(y_f, (0, n_pad - N))
    y2d = y_f.reshape(n_pad, 1)

    w2d = jnp.asarray(weight).reshape(1, D)                 # native dtype, tiny
    b2d = jnp.asarray(bias).reshape(1, 1).astype(jnp.float32)

    kernel = functools.partial(_binary_output_kernel,
                               tm=tm, n_valid=N, needs_mask=needs_mask)

    scores, lparts = pl.pallas_call(
        kernel,
        out_shape=(
            jax.ShapeDtypeStruct((n_pad, 1), jnp.float32),        # scores
            jax.ShapeDtypeStruct((num_tiles, 1, 1), jnp.float32),  # per-tile loss
        ),
        grid_spec=pltpu.PrefetchScalarGridSpec(
            num_scalar_prefetch=0,
            grid=(num_tiles,),
            in_specs=[
                pl.BlockSpec((tm, D), lambda i: (i, 0)),            # x tile
                pl.BlockSpec((1, D), lambda i: (0, 0)),             # weight (resident)
                pl.BlockSpec(memory_space=pltpu.MemorySpace.SMEM),  # bias scalar
                pl.BlockSpec((tm, 1), lambda i: (i, 0)),            # y tile
            ],
            out_specs=[
                pl.BlockSpec((tm, 1), lambda i: (i, 0)),            # scores tile
                pl.BlockSpec((1, 1, 1), lambda i: (i, 0, 0)),       # loss partial
            ],
        ),
        compiler_params=pltpu.CompilerParams(
            dimension_semantics=("parallel",),        # independent tiles -> both TCs on v7x
            vmem_limit_bytes=32 * 1024 * 1024,        # raise v5e's 16 MiB default
        ),
    )(x, w2d, b2d, y2d)

    loss = jnp.sum(lparts) / jnp.float32(N)   # finish the mean outside the kernel
    return scores[:N], loss


def _reference(x, y, weight, bias):
    z = x.astype(jnp.float32) @ weight.reshape(-1, 1).astype(jnp.float32)
    z = z + bias.astype(jnp.float32)
    s = jax.nn.sigmoid(z)
    yy = y.reshape(s.shape).astype(jnp.float32)
    log_s = jnp.maximum(jnp.log(s), -100.0)
    log_1ms = jnp.maximum(jnp.log(1.0 - s), -100.0)
    loss = jnp.mean(-(yy * log_s + (1.0 - yy) * log_1ms))
    return s, loss


if __name__ == "__main__":
    key = jax.random.PRNGKey(0)
    k_x, k_y, k_w, k_b, k_x2, k_y2, k_w2, k_b2 = jax.random.split(key, 8)

    # --- Test 1: small shapes consistent with the module (16 rows, emb_dim=32).
    N, dim = 16, 32
    x = jax.random.normal(k_x, (N, dim), dtype=jnp.float32)
    y = jax.random.bernoulli(k_y, 0.5, (N,)).astype(jnp.float32)
    bound = 1.0 / (dim ** 0.5)
    weight = jax.random.uniform(k_w, (1, dim), jnp.float32, -bound, bound)
    bias = jax.random.uniform(k_b, (1,), jnp.float32, -bound, bound)

    scores, loss = binary_output_layer(x, y, weight, bias)
    scores = jax.block_until_ready(scores)
    loss = jax.block_until_ready(loss)

    ref_scores, ref_loss = _reference(x, y, weight, bias)
    assert scores.shape == (N, 1)
    assert jnp.allclose(scores, ref_scores, atol=1e-5, rtol=1e-5)
    assert jnp.allclose(loss, ref_loss, atol=1e-5, rtol=1e-5)

    # --- Test 2: ragged row count + forced small tile -> multi-tile grid,
    #     padding mask, per-tile partial losses summed outside the kernel.
    N2, dim2 = 300, 64
    x2 = jax.random.normal(k_x2, (N2, dim2), dtype=jnp.float32)
    y2 = jax.random.bernoulli(k_y2, 0.5, (N2,)).astype(jnp.float32)
    bound2 = 1.0 / (dim2 ** 0.5)
    weight2 = jax.random.uniform(k_w2, (1, dim2), jnp.float32, -bound2, bound2)
    bias2 = jax.random.uniform(k_b2, (1,), jnp.float32, -bound2, bound2)

    scores2, loss2 = binary_output_layer(x2, y2, weight2, bias2, tm=128)
    scores2 = jax.block_until_ready(scores2)
    loss2 = jax.block_until_ready(loss2)

    ref_scores2, ref_loss2 = _reference(x2, y2, weight2, bias2)
    assert scores2.shape == (N2, 1)
    assert jnp.allclose(scores2, ref_scores2, atol=1e-5, rtol=1e-5)
    assert jnp.allclose(loss2, ref_loss2, atol=1e-5, rtol=1e-5)

    print("KERNEL_OK")
</pallas_src>

<mosaic_0001>
module attributes {stable_mosaic.version = 11 : i64} {
  func.func @_binary_output_kernel(%arg0: i32, %arg1: memref<16x32xf32, #tpu.memory_space<vmem>>, %arg2: memref<1x32xf32, #tpu.memory_space<vmem>>, %arg3: memref<1x1xf32, #tpu.memory_space<smem>>, %arg4: memref<16x1xf32, #tpu.memory_space<vmem>>, %arg5: memref<16x1xf32, #tpu.memory_space<vmem>>, %arg6: memref<1x1x1xf32, #tpu.memory_space<vmem>>) attributes {dimension_semantics = [#tpu.dimension_semantics<parallel>], iteration_bounds = array<i64: 1>, scalar_prefetch = 0 : i64, scratch_operands = 0 : i64, tpu.core_type = #tpu.core_type<tc>, window_params = [{transform_indices = @transform_0, window_bounds = array<i64: 16, 32>}, {pipeline_mode = #tpu.pipeline_mode<synchronous>, transform_indices = @transform_1, window_bounds = array<i64: 1, 32>}, {transform_indices = @transform_2, window_bounds = array<i64: 1, 1>}, {transform_indices = @transform_3, window_bounds = array<i64: 16, 1>}, {transform_indices = @transform_4, window_bounds = array<i64: 16, 1>}, {transform_indices = @transform_5, window_bounds = array<i64: 1, 1, 1>}]} {
    %c0 = arith.constant 0 : index
    %c0_0 = arith.constant 0 : index
    %0 = vector.load %arg1[%c0, %c0_0] : memref<16x32xf32, #tpu.memory_space<vmem>>, vector<16x32xf32>
    %c0_1 = arith.constant 0 : index
    %c0_2 = arith.constant 0 : index
    %1 = vector.load %arg2[%c0_1, %c0_2] : memref<1x32xf32, #tpu.memory_space<vmem>>, vector<1x32xf32>
    %c0_3 = arith.constant 0 : index
    %c0_4 = arith.constant 0 : index
    %2 = memref.load %arg3[%c0_3, %c0_4] : memref<1x1xf32, #tpu.memory_space<smem>>
    %3 = vector.broadcast %1 : vector<1x32xf32> to vector<16x32xf32>
    %4 = arith.mulf %0, %3 : vector<16x32xf32>
    %cst = arith.constant dense<0.000000e+00> : vector<16xf32>
    %5 = vector.multi_reduction <add>, %4, %cst [1] : vector<16x32xf32> to vector<16xf32>
    %6 = vector.shape_cast %5 : vector<16xf32> to vector<16x1xf32>
    %7 = vector.broadcast %2 : f32 to vector<16x1xf32>
    %8 = arith.addf %6, %7 : vector<16x1xf32>
    %9 = arith.negf %8 : vector<16x1xf32>
    %10 = math.exp %9 : vector<16x1xf32>
    %cst_5 = arith.constant 1.000000e+00 : f32
    %11 = vector.broadcast %cst_5 : f32 to vector<16x1xf32>
    %12 = arith.addf %11, %10 : vector<16x1xf32>
    %13 = arith.divf %11, %12 : vector<16x1xf32>
    %c0_6 = arith.constant 0 : index
    %c0_7 = arith.constant 0 : index
    %14 = vector.load %arg5[%c0_6, %c0_7] : memref<16x1xf32, #tpu.memory_space<vmem>>, vector<16x1xf32>
    tpu.vector_store %arg5[%c0_6, %c0_7], %13 {strides = array<i32>} : memref<16x1xf32, #tpu.memory_space<vmem>>, vector<16x1xf32>,
    %c0_8 = arith.constant 0 : index
    %c0_9 = arith.constant 0 : index
    %15 = vector.load %arg4[%c0_8, %c0_9] : memref<16x1xf32, #tpu.memory_space<vmem>>, vector<16x1xf32>
    %16 = math.log %13 : vector<16x1xf32>
    %cst_10 = arith.constant -1.000000e+02 : f32
    %17 = vector.broadcast %cst_10 : f32 to vector<16x1xf32>
    %18 = arith.maximumf %16, %17 : vector<16x1xf32>
    %cst_11 = arith.constant 1.000000e+00 : f32
    %19 = vector.broadcast %cst_11 : f32 to vector<16x1xf32>
    %20 = arith.subf %19, %13 : vector<16x1xf32>
    %21 = math.log %20 : vector<16x1xf32>
    %cst_12 = arith.constant -1.000000e+02 : f32
    %22 = vector.broadcast %cst_12 : f32 to vector<16x1xf32>
    %23 = arith.maximumf %21, %22 : vector<16x1xf32>
    %24 = arith.mulf %15, %18 : vector<16x1xf32>
    %cst_13 = arith.constant 1.000000e+00 : f32
    %25 = vector.broadcast %cst_13 : f32 to vector<16x1xf32>
    %26 = arith.subf %25, %15 : vector<16x1xf32>
    %27 = arith.mulf %26, %23 : vector<16x1xf32>
    %28 = arith.addf %24, %27 : vector<16x1xf32>
    %cst_14 = arith.constant 0.000000e+00 : f32
    %29 = vector.broadcast %cst_14 : f32 to vector<16x1xf32>
    %30 = arith.subf %29, %28 : vector<16x1xf32>
    %31 = vector.shape_cast %30 : vector<16x1xf32> to vector<1x16x1xf32>
    %cst_15 = arith.constant dense<0.000000e+00> : vector<1xf32>
    %32 = vector.multi_reduction <add>, %31, %cst_15 [1, 2] : vector<1x16x1xf32> to vector<1xf32>
    %33 = vector.shape_cast %32 : vector<1xf32> to vector<1x1x1xf32>
    %34 = vector.extract %33[0, 0, 0] : f32 from vector<1x1x1xf32>
    %35 = vector.broadcast %34 : f32 to vector<1x1xf32>
    %36 = vector.shape_cast %35 : vector<1x1xf32> to vector<1x1x1xf32>
    %c0_16 = arith.constant 0 : index
    %c0_17 = arith.constant 0 : index
    %c0_18 = arith.constant 0 : index
    %37 = vector.load %arg6[%c0_16, %c0_17, %c0_18] : memref<1x1x1xf32, #tpu.memory_space<vmem>>, vector<1x1x1xf32>
    tpu.vector_store %arg6[%c0_16, %c0_17, %c0_18], %36 {strides = array<i32>} : memref<1x1x1xf32, #tpu.memory_space<vmem>>, vector<1x1x1xf32>,
    return
  }
  func.func @transform_0(%arg0: i32) -> (i32, i32) {
    %c0_i32 = arith.constant 0 : i32
    %c0_i32_0 = arith.constant 0 : i32
    return %arg0, %c0_i32 : i32, i32
  }
  func.func @transform_1(%arg0: i32) -> (i32, i32) {
    %c0_i32 = arith.constant 0 : i32
    %c0_i32_0 = arith.constant 0 : i32
    %c0_i32_1 = arith.constant 0 : i32
    return %c0_i32, %c0_i32_0 : i32, i32
  }
  func.func @transform_2(%arg0: i32) -> (i32, i32) {
    %c0_i32 = arith.constant 0 : i32
    %c0_i32_0 = arith.constant 0 : i32
    %c0_i32_1 = arith.constant 0 : i32
    return %c0_i32, %c0_i32_0 : i32, i32
  }
  func.func @transform_3(%arg0: i32) -> (i32, i32) {
    %c0_i32 = arith.constant 0 : i32
    %c0_i32_0 = arith.constant 0 : i32
    return %arg0, %c0_i32 : i32, i32
  }
  func.func @transform_4(%arg0: i32) -> (i32, i32) {
    %c0_i32 = arith.constant 0 : i32
    %c0_i32_0 = arith.constant 0 : i32
    return %arg0, %c0_i32 : i32, i32
  }
  func.func @transform_5(%arg0: i32) -> (i32, i32, i32) {
    %c0_i32 = arith.constant 0 : i32
    %c0_i32_0 = arith.constant 0 : i32
    %c0_i32_1 = arith.constant 0 : i32
    return %arg0, %c0_i32, %c0_i32_0 : i32, i32, i32
  }
}

</mosaic_0001>

<bundles_post_ra>
// kernel: tpu_custom_call.1
= control target key start
LH: loop header
LB: loop body
LE: loop exit
PB: predicated region body
PF: predicated region fallthrough
CT: control target
= control target key end

     0   :  { %vm33_vm0 = vcmask 261120   ;;  %s234_s0 = inlined_call_operand.vmem [shape: f32[16,32], index: 0, kind: input, shape index: {}]   ;;  %s235_s1 = inlined_call_operand.vmem [shape: f32[1,32], index: 1, kind: input, shape index: {}]   ;;  %s236_s2 = inlined_call_operand.<no memory space> [shape: f32[1,1], index: 2, kind: input, shape index: {}]   ;;  %s237_s3 = inlined_call_operand.vmem [shape: f32[16,1], index: 3, kind: input, shape index: {}]   ;;  %s238_s4 = inlined_call_operand.vmem [shape: f32[16,1], index: 4, kind: output, shape index: {0}]   ;;  %s239_s5 = inlined_call_operand.hbm [shape: f32[1,1,1], index: 5, kind: output, shape index: {1}]  }
   0x1   :  { %v21_v0 = vld [vmem:[%s234_s0] sm:$0xff]  ;;  %v22_v2 = vld [vmem:[%s234_s0 + $0x8] sm:$0xff] }
   0x2   :  { %v117_v1 = vld [vmem:[%s235_s1] ss:$0 sm:$0xff] }
   0x3   :  { %v31_v3 = vmul.f32 %v117_v1, %v21_v0  ;;  %v32_v4 = vmul.f32 %v117_v1, %v22_v2 }
   0x4   :  { %12 = vsyncpa [#allocation4], 0  ;;  %v40_v7 = vstv %s236_s2  ;;  %vm55_vm1 = vcmask 7168   ;;  %v58_v23 = vld [vmem:[%s237_s3] sm:$0xff]  ;;  %v59_v26 = vld [vmem:[%s237_s3 + $0x8] sm:$0xff]  ;;  %s163_s3 = smov [#allocation3]  }
   0x5   :  { %v34_v5 = vsel %vm33_vm0, %v31_v3, 0.0  ;;  %v37_v6 = vsel %vm33_vm0, %v32_v4, 0.0  ;;  %v76_v29 = vsub.f32 1.0, %v58_v23  ;;  %v77_v34 = vsub.f32 1.0, %v59_v26 }
   0x6   :  { %35 = vadd.xlane.f32.xlu0 %v34_v5  ;;  %vm97_vm2 = vcmask 0  }
   0xa   :  { %38 = vadd.xlane.f32.xlu0 %v37_v6 }
  0x93   :  { %v36_v8 = vpop.xlane.xlu0 %35 }
  0x94   :  { %v41_v9 = vadd.f32 %v40_v7, %v36_v8 }
  0x96   :  { %v118_v10 = vmul.f32 -1.442695, %v41_v9 }
  0x97   :  { %v39_v11 = vpop.xlane.xlu0 %38 }
  0x98   :  { %123 = vpow2.f32 %v118_v10  ;;  %v42_v12 = vadd.f32 %v40_v7, %v39_v11 }
  0x9a   :  { %v119_v13 = vmul.f32 -1.442695, %v42_v12 }
  0x9c   :  { %125 = vpow2.f32 %v119_v13 }
  0xa2   :  { %v124_v14 = vpop.eup %123 }
  0xa3   :  { %v49_v15 = vadd.f32 1.0, %v124_v14 }
  0xa5   :  { %127 = vrcp.f32 %v49_v15 }
  0xa6   :  { %v126_v16 = vpop.eup %125 }
  0xa7   :  { %v50_v17 = vadd.f32 1.0, %v126_v16 }
  0xa9   :  { %129 = vrcp.f32 %v50_v17 }
  0xaf   :  { %v128_v18 = vpop.eup %127 }
  0xb0   :  { %56 = vst.msk [vmem:[%s238_s4] sm:$0xff] %vm55_vm1, %v128_v18  ;;  %131 = vlog2.f32 %v128_v18  ;;  %v66_v19 = vsub.f32 1.0, %v128_v18 }
  0xb2   :  { %133 = vlog2.f32 %v66_v19 }
  0xb3   :  { %v130_v20 = vpop.eup %129 }
  0xb4   :  { %135 = vlog2.f32 %v130_v20  ;;  %v67_v21 = vsub.f32 1.0, %v130_v20  ;;  %57 = vst.msk [vmem:[%s238_s4 + $0x8] sm:$0xff] %vm55_vm1, %v130_v20  ;;  %s107_s4 = sshll.u32 %s163_s3, 4  ;;  %s108_s4 = int_to_ptr.vmem [resolvable:$true] %s107_s4 }
  0xb5   :  { %s139_s7 = scalar_lea.vmem %s108_s4, 16  ;;  %s143_s8 = scalar_lea.vmem %s108_s4, 32 }
  0xb6   :  { %137 = vlog2.f32 %v67_v21  ;;  %p140_p0 = scmp.ne.s32.totalorder %s108_s4, %s139_s7  ;;  %p144_p1 = scmp.lt.s32.totalorder %s108_s4, %s108_s4 }
  0xb7   :  { %p145_p2 = scmp.lt.s32.totalorder %s143_s8, %s139_s7 }
  0xb9   :  { %p146_p3 = por %p145_p2, %p144_p1 }
  0xba   :  { %v132_v22 = vpop.eup %131 }
  0xbb   :  { %v61_v24 = vmul.f32 0.6931472, %v132_v22  ;;  %p147_p4 = pnand %p146_p3, %p140_p0 }
  0xbc   :  { %v134_v25 = vpop.eup %133 }
  0xbd   :  { %v64_v27 = vmax.f32 %v61_v24, -100.0  ;;  %v69_v28 = vmul.f32 0.6931472, %v134_v25 }
  0xbe   :  { %v136_v30 = vpop.eup %135 }
  0xbf   :  { %v63_v31 = vmul.f32 0.6931472, %v136_v30  ;;  %v72_v32 = vmax.f32 %v69_v28, -100.0  ;;  %v74_v37 = vmul.f32 %v64_v27, %v58_v23 }
  0xc0   :  { %v138_v33 = vpop.eup %137 }
  0xc1   :  { %v65_v35 = vmax.f32 %v63_v31, -100.0  ;;  %v71_v36 = vmul.f32 0.6931472, %v138_v33  ;;  %v78_v38 = vmul.f32 %v76_v29, %v72_v32 }
  0xc3   :  { %v73_v39 = vmax.f32 %v71_v36, -100.0  ;;  %v80_v40 = vadd.f32 %v78_v38, %v74_v37  ;;  %v75_v41 = vmul.f32 %v65_v35, %v59_v26 }
  0xc5   :  { %v79_v42 = vmul.f32 %v77_v34, %v73_v39  ;;  %v82_v44 = vsub.f32 0.0, %v80_v40 }
  0xc7   :  { %v81_v43 = vadd.f32 %v79_v42, %v75_v41  ;;  %v84_v46 = vsel %vm55_vm1, %v82_v44, 0.0 }
  0xc9   :  { %v83_v45 = vsub.f32 0.0, %v81_v43 }
  0xcb   :  { %v85_v47 = vsel %vm55_vm1, %v83_v45, 0.0 }
  0xcc   :  { %v86_v48 = vadd.f32 %v85_v47, %v84_v46 }
  0xce   :  { %87 = vadd.xlane.f32.xlu1 %v86_v48 }
 0x15b   :  { %v88_v49 = vpop.xlane.xlu1 %87 }
 0x15c   :  { %v89_v50 = vrot.slane %v88_v49, 4 }
 0x15e   :  { %v90_v51 = vadd.f32 %v89_v50, %v88_v49 }
 0x160   :  { %v91_v52 = vrot.slane %v90_v51, 2 }
 0x162   :  { %v92_v53 = vadd.f32 %v91_v52, %v90_v51 }
 0x164   :  { %v93_v54 = vrot.slane %v92_v53, 1 }
 0x166   :  { %v94_v55 = vadd.f32 %v93_v54, %v92_v53 }
 0x168   :  { %120 = vpush %v94_v55 }
 0x199   :  { %s121_s6 = spop %120 }
 0x19a   :  { %v96_v56 = vstv %s121_s6 }
 0x19b   :  { %98 = vst.msk [vmem:[#allocation3] sm:$0x1] %vm97_vm2, %v96_v56 }
 0x19c   :  { %150 = shalt.err (!%p147_p4)
}
 0x19d   :  { %s151_s11 = scalar_lea.hbm %s239_s5, 16 }
 0x19e   :  { %p152_p5 = scmp.ne.s32.totalorder %s239_s5, %s151_s11  ;;  %p155_p6 = scmp.lt.u32.totalorder %s151_s11, %s239_s5 }
 0x1a0   :  { %p157_p7 = pnand %p155_p6, %p152_p5 }
 0x1a2   :  { %160 = shalt.err (!%p157_p7)
}
 0x1a3   :  { %110 = dma.vmem_to_hbm [thread:$0]  %s108_s4, 16, %s239_s5, [#allocation4]  }
 0x1a4   :  { %161 = dma.done.wait [#allocation4], 16  }
 0x1a5   :  { %162 = vsyncadd [#allocation4], 4294967280 }
 0x1a6   :  { %116 = vsyncpa [#allocation4], 1 }

</bundles_post_ra>
